<compile_context>
chip_gen: v5e
topology: v5e:2x2
jax: 0.10.0
libtpu: 0.0.40
codegen_flags: <defaults>
</compile_context>

<pallas_src>
import jax
import jax.numpy as jnp
from jax import lax
from jax.experimental import pallas as pl
from jax.experimental.pallas import tpu as pltpu

TILE_B_MAX = 8192   # max lanes DMA'd per grid step (multiple of CHUNK_MAX)
CHUNK_MAX = 512     # compute sub-chunk: bounds h1/h2 to <= ~192 KiB f32


def _round_up(n, m):
    return ((n + m - 1) // m) * m


def _make_kernel(chunk, n_chunks):
    """MLP kernel operating feature-major: x_ref (13, tile_b), o_ref (nc, tile_b)."""

    def _mlp_kernel(x_ref, w1_ref, b1_ref, w2_ref, b2_ref, w3_ref, b3_ref, o_ref):
        w1 = w1_ref[...]
        b1 = b1_ref[...]
        w2 = w2_ref[...]
        b2 = b2_ref[...]
        w3 = w3_ref[...]
        b3 = b3_ref[...]

        def body(c, carry):
            off = pl.multiple_of(c * chunk, 128)
            xc = x_ref[:, pl.ds(off, chunk)]                       # (13, chunk)
            h1 = jnp.dot(w1, xc, preferred_element_type=jnp.float32) + b1
            h1 = jnp.maximum(h1, 0.0)                              # (64, chunk)
            h2 = jnp.dot(w2, h1, preferred_element_type=jnp.float32) + b2
            h2 = jnp.maximum(h2, 0.0)                              # (32, chunk)
            h3 = jnp.dot(w3, h2, preferred_element_type=jnp.float32) + b3
            o_ref[:, pl.ds(off, chunk)] = h3.astype(o_ref.dtype)   # (nc, chunk)
            return carry

        lax.fori_loop(0, n_chunks, body, 0, unroll=True)

    return _mlp_kernel


def voice_id_forward(x, params):
    """x: (B, input_dim) float32.

    params (PyTorch nn.Linear storage):
      w1: (64, input_dim)   b1: (64, 1)
      w2: (32, 64)          b2: (32, 1)
      w3: (num_classes, 32) b3: (num_classes, 1)
    Returns (B, num_classes) float32.
    """
    B, D = x.shape
    nc = params["w3"].shape[0]

    # Pad batch only to a lane multiple; grid handles a ragged last block.
    B_pad = _round_up(max(B, 1), 128)

    # Tile: aim for >=2 grid steps (v7x megacore sharding) but cap for overhead /
    # VMEM; make the tile a multiple of the compute chunk.
    tile_b = min(TILE_B_MAX, _round_up(pl.cdiv(B_pad, 2), 128))
    if tile_b > CHUNK_MAX:
        tile_b = _round_up(tile_b, CHUNK_MAX)
        chunk = CHUNK_MAX
    else:
        chunk = tile_b
    n_chunks = tile_b // chunk

    grid = (pl.cdiv(B_pad, tile_b),)

    # Feature-major input; transpose+pad fuse into one pass under jit.
    x_cn = x.T
    if B_pad != B:
        x_cn = jnp.pad(x_cn, ((0, 0), (0, B_pad - B)))

    # x / out tiles walk the batch; weights & biases are resident (constant block).
    x_spec = pl.BlockSpec((D, tile_b), lambda i: (0, i))
    out_spec = pl.BlockSpec((nc, tile_b), lambda i: (0, i))

    def _resident(shape):
        # TODO(synk): could pre-pack the six tiny param arrays into one block (or
        # pipeline_mode=pl.Buffered(1)) to trim per-call DMA setup; minor.
        return pl.BlockSpec(shape, lambda i: (0, 0))

    w1, b1 = params["w1"], params["b1"]
    w2, b2 = params["w2"], params["b2"]
    w3, b3 = params["w3"], params["b3"]

    out_cn = pl.pallas_call(
        _make_kernel(chunk, n_chunks),
        out_shape=jax.ShapeDtypeStruct((nc, B_pad), jnp.float32),
        grid=grid,
        in_specs=[
            x_spec,
            _resident(w1.shape), _resident(b1.shape),
            _resident(w2.shape), _resident(b2.shape),
            _resident(w3.shape), _resident(b3.shape),
        ],
        out_specs=out_spec,
        compiler_params=pltpu.CompilerParams(
            dimension_semantics=("parallel",)),
    )(x_cn, w1, b1, w2, b2, w3, b3)

    # Back to the PyTorch-facing (B, num_classes) layout, dropping pad columns.
    return out_cn[:, :B].T


def init_params(key, input_dim=13, num_classes=1):
    """Deterministic init mimicking nn.Linear's U(-1/sqrt(fan_in), 1/sqrt(fan_in)).

    Weights stored (out_features, in_features) like PyTorch; biases as (out, 1).
    """
    dims = [(input_dim, 64), (64, 32), (32, num_classes)]
    params = {}
    for i, (fan_in, fan_out) in enumerate(dims, start=1):
        key, kw, kb = jax.random.split(key, 3)
        bound = 1.0 / (fan_in ** 0.5)
        params[f"w{i}"] = jax.random.uniform(
            kw, (fan_out, fan_in), jnp.float32, -bound, bound)
        params[f"b{i}"] = jax.random.uniform(
            kb, (fan_out, 1), jnp.float32, -bound, bound)
    return params


def reference_forward(x, params):
    h = jnp.maximum(x @ params["w1"].T + params["b1"].T, 0.0)
    h = jnp.maximum(h @ params["w2"].T + params["b2"].T, 0.0)
    return h @ params["w3"].T + params["b3"].T


if __name__ == "__main__":
    key = jax.random.PRNGKey(0)
    key, kx = jax.random.split(key)

    B, input_dim, num_classes = 8, 13, 1
    x = jax.random.normal(kx, (B, input_dim), jnp.float32)
    params = init_params(key, input_dim=input_dim, num_classes=num_classes)

    fwd = jax.jit(voice_id_forward)
    out = fwd(x, params)
    out = jax.block_until_ready(out)

    ref = reference_forward(x, params)
    assert out.shape == (B, num_classes)
    assert jnp.allclose(out, ref, atol=1e-5, rtol=1e-5), "mismatch vs JAX reference"

    print("KERNEL_OK")
</pallas_src>

<mosaic_0001>
module attributes {stable_mosaic.version = 11 : i64} {
  func.func @_mlp_kernel(%arg0: i32, %arg1: memref<13x128xf32, #tpu.memory_space<vmem>>, %arg2: memref<64x13xf32, #tpu.memory_space<vmem>>, %arg3: memref<64x1xf32, #tpu.memory_space<vmem>>, %arg4: memref<32x64xf32, #tpu.memory_space<vmem>>, %arg5: memref<32x1xf32, #tpu.memory_space<vmem>>, %arg6: memref<1x32xf32, #tpu.memory_space<vmem>>, %arg7: memref<1x1xf32, #tpu.memory_space<vmem>>, %arg8: memref<1x128xf32, #tpu.memory_space<vmem>>) attributes {dimension_semantics = [#tpu.dimension_semantics<parallel>], iteration_bounds = array<i64: 1>, scalar_prefetch = 0 : i64, scratch_operands = 0 : i64, tpu.core_type = #tpu.core_type<tc>, window_params = [{transform_indices = @transform_0, window_bounds = array<i64: 13, 128>}, {pipeline_mode = #tpu.pipeline_mode<synchronous>, transform_indices = @transform_1, window_bounds = array<i64: 64, 13>}, {pipeline_mode = #tpu.pipeline_mode<synchronous>, transform_indices = @transform_2, window_bounds = array<i64: 64, 1>}, {pipeline_mode = #tpu.pipeline_mode<synchronous>, transform_indices = @transform_3, window_bounds = array<i64: 32, 64>}, {pipeline_mode = #tpu.pipeline_mode<synchronous>, transform_indices = @transform_4, window_bounds = array<i64: 32, 1>}, {pipeline_mode = #tpu.pipeline_mode<synchronous>, transform_indices = @transform_5, window_bounds = array<i64: 1, 32>}, {pipeline_mode = #tpu.pipeline_mode<synchronous>, transform_indices = @transform_6, window_bounds = array<i64: 1, 1>}, {transform_indices = @transform_7, window_bounds = array<i64: 1, 128>}]} {
    %c0 = arith.constant 0 : index
    %c0_0 = arith.constant 0 : index
    %0 = vector.load %arg2[%c0, %c0_0] : memref<64x13xf32, #tpu.memory_space<vmem>>, vector<64x13xf32>
    %c0_1 = arith.constant 0 : index
    %c0_2 = arith.constant 0 : index
    %1 = vector.load %arg3[%c0_1, %c0_2] : memref<64x1xf32, #tpu.memory_space<vmem>>, vector<64x1xf32>
    %c0_3 = arith.constant 0 : index
    %c0_4 = arith.constant 0 : index
    %2 = vector.load %arg4[%c0_3, %c0_4] : memref<32x64xf32, #tpu.memory_space<vmem>>, vector<32x64xf32>
    %c0_5 = arith.constant 0 : index
    %c0_6 = arith.constant 0 : index
    %3 = vector.load %arg5[%c0_5, %c0_6] : memref<32x1xf32, #tpu.memory_space<vmem>>, vector<32x1xf32>
    %c0_7 = arith.constant 0 : index
    %c0_8 = arith.constant 0 : index
    %4 = vector.load %arg6[%c0_7, %c0_8] : memref<1x32xf32, #tpu.memory_space<vmem>>, vector<1x32xf32>
    %c0_9 = arith.constant 0 : index
    %c0_10 = arith.constant 0 : index
    %5 = vector.load %arg7[%c0_9, %c0_10] : memref<1x1xf32, #tpu.memory_space<vmem>>, vector<1x1xf32>
    %c0_i32 = arith.constant 0 : i32
    %c128_i32 = arith.constant 128 : i32
    %6 = arith.muli %c0_i32, %c128_i32 : i32
    %7 = tpu.assume_multiple %6, 128 : i32
    %c0_11 = arith.constant 0 : index
    %8 = arith.index_cast %7 : i32 to index
    %9 = vector.load %arg1[%c0_11, %8] : memref<13x128xf32, #tpu.memory_space<vmem>>, vector<13x128xf32>
    %cst = arith.constant dense<0.000000e+00> : vector<64x128xf32>
    %10 = tpu.matmul %0, %9, %cst {dimension_numbers = #tpu.dot_dimension_numbers<[1], [0], [0], [1], [0, 0, 1, 1], [], []>} : vector<64x13xf32>, vector<13x128xf32>, vector<64x128xf32> -> vector<64x128xf32>
    %11 = vector.broadcast %1 : vector<64x1xf32> to vector<64x128xf32>
    %12 = arith.addf %10, %11 : vector<64x128xf32>
    %cst_12 = arith.constant 0.000000e+00 : f32
    %13 = vector.broadcast %cst_12 : f32 to vector<64x128xf32>
    %14 = arith.maximumf %12, %13 : vector<64x128xf32>
    %cst_13 = arith.constant dense<0.000000e+00> : vector<32x128xf32>
    %15 = tpu.matmul %2, %14, %cst_13 {dimension_numbers = #tpu.dot_dimension_numbers<[1], [0], [0], [1], [0, 0, 1, 1], [], []>} : vector<32x64xf32>, vector<64x128xf32>, vector<32x128xf32> -> vector<32x128xf32>
    %16 = vector.broadcast %3 : vector<32x1xf32> to vector<32x128xf32>
    %17 = arith.addf %15, %16 : vector<32x128xf32>
    %cst_14 = arith.constant 0.000000e+00 : f32
    %18 = vector.broadcast %cst_14 : f32 to vector<32x128xf32>
    %19 = arith.maximumf %17, %18 : vector<32x128xf32>
    %cst_15 = arith.constant dense<0.000000e+00> : vector<1x128xf32>
    %20 = tpu.matmul %4, %19, %cst_15 {dimension_numbers = #tpu.dot_dimension_numbers<[1], [0], [0], [1], [0, 0, 1, 1], [], []>} : vector<1x32xf32>, vector<32x128xf32>, vector<1x128xf32> -> vector<1x128xf32>
    %21 = vector.broadcast %5 : vector<1x1xf32> to vector<1x128xf32>
    %22 = arith.addf %20, %21 : vector<1x128xf32>
    %c0_16 = arith.constant 0 : index
    %23 = arith.index_cast %7 : i32 to index
    %24 = vector.load %arg8[%c0_16, %23] : memref<1x128xf32, #tpu.memory_space<vmem>>, vector<1x128xf32>
    tpu.vector_store %arg8[%c0_16, %23], %22 {strides = array<i32>} : memref<1x128xf32, #tpu.memory_space<vmem>>, vector<1x128xf32>,
    %c1_i32 = arith.constant 1 : i32
    return
  }
  func.func @transform_0(%arg0: i32) -> (i32, i32) {
    %c0_i32 = arith.constant 0 : i32
    %c0_i32_0 = arith.constant 0 : i32
    return %c0_i32, %arg0 : i32, i32
  }
  func.func @transform_1(%arg0: i32) -> (i32, i32) {
    %c0_i32 = arith.constant 0 : i32
    %c0_i32_0 = arith.constant 0 : i32
    %c0_i32_1 = arith.constant 0 : i32
    return %c0_i32, %c0_i32_0 : i32, i32
  }
  func.func @transform_2(%arg0: i32) -> (i32, i32) {
    %c0_i32 = arith.constant 0 : i32
    %c0_i32_0 = arith.constant 0 : i32
    %c0_i32_1 = arith.constant 0 : i32
    return %c0_i32, %c0_i32_0 : i32, i32
  }
  func.func @transform_3(%arg0: i32) -> (i32, i32) {
    %c0_i32 = arith.constant 0 : i32
    %c0_i32_0 = arith.constant 0 : i32
    %c0_i32_1 = arith.constant 0 : i32
    return %c0_i32, %c0_i32_0 : i32, i32
  }
  func.func @transform_4(%arg0: i32) -> (i32, i32) {
    %c0_i32 = arith.constant 0 : i32
    %c0_i32_0 = arith.constant 0 : i32
    %c0_i32_1 = arith.constant 0 : i32
    return %c0_i32, %c0_i32_0 : i32, i32
  }
  func.func @transform_5(%arg0: i32) -> (i32, i32) {
    %c0_i32 = arith.constant 0 : i32
    %c0_i32_0 = arith.constant 0 : i32
    %c0_i32_1 = arith.constant 0 : i32
    return %c0_i32, %c0_i32_0 : i32, i32
  }
  func.func @transform_6(%arg0: i32) -> (i32, i32) {
    %c0_i32 = arith.constant 0 : i32
    %c0_i32_0 = arith.constant 0 : i32
    %c0_i32_1 = arith.constant 0 : i32
    return %c0_i32, %c0_i32_0 : i32, i32
  }
  func.func @transform_7(%arg0: i32) -> (i32, i32) {
    %c0_i32 = arith.constant 0 : i32
    %c0_i32_0 = arith.constant 0 : i32
    return %c0_i32, %arg0 : i32, i32
  }
}

</mosaic_0001>

<bundles_post_ra>
// kernel: voice_id_forward.1
= control target key start
LH: loop header
LB: loop body
LE: loop exit
PB: predicated region body
PF: predicated region fallthrough
CT: control target
= control target key end

     0   :  { %vm121_vm0 = vcmask 1044480   ;;  %v303_v2 = vmov 0   ;;  %vm96_vm1 = vcmask 105472   ;;  %vm194_vm2 = vcmask 523264   ;;  %s439_s0 = inlined_call_operand.vmem [shape: f32[13,128], index: 0, kind: input, shape index: {}]   ;;  %s440_s1 = inlined_call_operand.vmem [shape: f32[64,13], index: 1, kind: input, shape index: {}]   ;;  %s441_s2 = inlined_call_operand.vmem [shape: f32[64,1], index: 2, kind: input, shape index: {}]   ;;  %s442_s6 = inlined_call_operand.<no memory space> [shape: f32[1,1], index: 6, kind: input, shape index: {}]   ;;  %s443_s4 = inlined_call_operand.vmem [shape: f32[32,1], index: 4, kind: input, shape index: {}]   ;;  %s444_s3 = inlined_call_operand.vmem [shape: f32[32,64], index: 3, kind: input, shape index: {}]   ;;  %s445_s5 = inlined_call_operand.vmem [shape: f32[1,32], index: 5, kind: input, shape index: {}]   ;;  %s446_s7 = inlined_call_operand.vmem [shape: f32[1,128], index: 7, kind: output, shape index: {}]  }
   0x1   :  { %v55_v0 = vld [vmem:[%s439_s0 + $0x8] sm:$0x1f]  ;;  %v54_v1 = vld [vmem:[%s439_s0] sm:$0xff]  ;;  %300 = vset.pattern.permute.xlu0 %v303_v2  ;;  %301 = vset.pattern.permute.xlu1 %v303_v2  ;;  %v12_v3 = vstv %s442_s6  ;;  %v43_v5 = vld [vmem:[%s441_s2 + $0x38] sm:$0xff]  ;;  %vm246_vm3 = vcmask 261120  }
   0x2   :  { %289 = vmatpush.msk.msra.mxu3 %vm121_vm0, %v55_v0  ;;  %v32_v4 = vld [vmem:[%s440_s1 + $0x20] sm:$0xff]  ;;  %275 = vmatpush.msk.msra.mxu0 %vm121_vm0, %v55_v0  ;;  %13 = vst [vmem:[#allocation2] sm:$0x1] %v12_v3  ;;  %v41_v7 = vld [vmem:[%s441_s2 + $0x28] sm:$0xff]  ;;  %v39_v8 = vld [vmem:[%s441_s2 + $0x18] sm:$0xff] }
   0x3   :  { %v28_v6 = vld [vmem:[%s440_s1] sm:$0xff]  ;;  %93 = vperm.xlu0 %300, %v43_v5   ;;  %302 = vset.pattern.permute.xlu2 %v303_v2  ;;  %v42_v9 = vld [vmem:[%s441_s2 + $0x30] sm:$0xff]  ;;  %v33_v10 = vld [vmem:[%s440_s1 + $0x28] sm:$0xff] }
   0x4   :  { %290 = vmatpush.msra.mxu3 %v54_v1  ;;  %140 = vmatpush.msra.mxu0 %v54_v1  ;;  %v29_v11 = vld [vmem:[%s440_s1 + $0x8] sm:$0xff]  ;;  %v40_v12 = vld [vmem:[%s441_s2 + $0x20] sm:$0xff]  ;;  %v38_v13 = vld [vmem:[%s441_s2 + $0x10] sm:$0xff] }
   0x5   :  { %280 = vmatmul.msk.f32.vlgmr.msra.gmra.mxu3 %vm96_vm1, %v32_v4  ;;  %276 = vmatmul.msk.f32.vlgmr.msra.gmra.mxu0 %vm96_vm1, %v28_v6  ;;  %v37_v14 = vld [vmem:[%s441_s2 + $0x8] sm:$0xff]  ;;  %v34_v15 = vld [vmem:[%s440_s1 + $0x30] sm:$0xff]  ;;  %v36_v17 = vld [vmem:[%s441_s2] sm:$0xff] }
   0x6   :  { %83 = vperm.xlu1 %301, %v41_v7   ;;  %73 = vperm.xlu2 %302, %v39_v8   ;;  %v30_v16 = vld [vmem:[%s440_s1 + $0x10] sm:$0xff]  ;;  %v51_v18 = vld [vmem:[%s443_s4 + $0x18] sm:$0xff]  ;;  %v49_v22 = vld [vmem:[%s443_s4 + $0x8] sm:$0xff] }
   0x7   :  { %v50_v19 = vld [vmem:[%s443_s4 + $0x10] sm:$0xff]  ;;  %v35_v20 = vld [vmem:[%s440_s1 + $0x38] sm:$0xff]  ;;  %v48_v23 = vld [vmem:[%s443_s4] sm:$0xff] }
   0x8   :  { %v31_v21 = vld [vmem:[%s440_s1 + $0x18] sm:$0xff]  ;;  %v44_v57 = vld [vmem:[%s444_s3] sm:$0xff]  ;;  %v45_v59 = vld [vmem:[%s444_s3 + $0x8] sm:$0xff] }
   0x9   :  { %v53_v24 = vld [vmem:[#allocation2] sm:$0x1]  ;;  %v47_v58 = vld [vmem:[%s444_s3 + $0x18] sm:$0xff]  ;;  %v46_v60 = vld [vmem:[%s444_s3 + $0x10] sm:$0xff] }
   0xb   :  { %88 = vperm.xlu0 %300, %v42_v9  }
   0xd   :  { %281 = vmatmul.msk.f32.gmra.mxu3 %vm96_vm1, %v33_v10  ;;  %277 = vmatmul.msk.f32.gmra.mxu0 %vm96_vm1, %v29_v11 }
   0xe   :  { %78 = vperm.xlu1 %301, %v40_v12   ;;  %68 = vperm.xlu2 %302, %v38_v13   ;;  %v52_v13 = vld [vmem:[%s445_s5] sm:$0x1] }
  0x13   :  { %63 = vperm.xlu0 %300, %v37_v14  }
  0x15   :  { %282 = vmatmul.msk.f32.gmra.mxu3 %vm96_vm1, %v34_v15  ;;  %278 = vmatmul.msk.f32.gmra.mxu0 %vm96_vm1, %v30_v16 }
  0x16   :  { %58 = vperm.xlu1 %301, %v36_v17   ;;  %191 = vperm.xlu2 %302, %v51_v18  }
  0x1b   :  { %186 = vperm.xlu0 %300, %v50_v19  }
  0x1d   :  { %283 = vmatmul.msk.f32.gmra.mxu3 %vm96_vm1, %v35_v20  ;;  %279 = vmatmul.msk.f32.gmra.mxu0 %vm96_vm1, %v31_v21 }
  0x1e   :  { %181 = vperm.xlu1 %301, %v49_v22   ;;  %176 = vperm.xlu2 %302, %v48_v23  }
  0x23   :  { %242 = vperm.xlu0 %300, %v53_v24  }
  0x60   :  { %v74_v33 = vpop.permute.xlu2 %73 }
  0x68   :  { %v69_v46 = vpop.permute.xlu2 %68 }
  0x70   :  { %v192_v62 = vpop.permute.xlu2 %191 }
  0x75   :  { %v94_v29 = vpop.permute.xlu0 %93 }
  0x78   :  { %v84_v30 = vpop.permute.xlu1 %83  ;;  %v177_v8 = vpop.permute.xlu2 %176 }
  0x7d   :  { %v89_v34 = vpop.permute.xlu0 %88 }
  0x80   :  { %v79_v35 = vpop.permute.xlu1 %78 }
  0x82   :  { %v142_v25 = vpop.f32.mrf.mxu0 }
  0x85   :  { %v64_v49 = vpop.permute.xlu0 %63 }
  0x88   :  { %v154_v26 = vpop.f32.mrf.mxu3  ;;  %v59_v50 = vpop.permute.xlu1 %58 }
  0x89   :  { %v155_v42 = vadd.f32 %v154_v26, %v79_v35  ;;  %v143_v53 = vadd.f32 %v142_v25, %v59_v50 }
  0x8a   :  { %v145_v28 = vpop.f32.mrf.mxu0 }
  0x8b   :  { %v170_v47 = vmax.f32 %v155_v42, 0.0  ;;  %v146_v51 = vadd.f32 %v145_v28, %v64_v49  ;;  %v166_v56 = vmax.f32 %v143_v53, 0.0 }
  0x8d   :  { %v167_v55 = vmax.f32 %v146_v51, 0.0  ;;  %v187_v3 = vpop.permute.xlu0 %186 }
  0x90   :  { %v157_v27 = vpop.f32.mrf.mxu3  ;;  %v182_v4 = vpop.permute.xlu1 %181 }
  0x91   :  { %v158_v39 = vadd.f32 %v157_v27, %v84_v30 }
  0x92   :  { %v148_v32 = vpop.f32.mrf.mxu0 }
  0x93   :  { %v171_v44 = vmax.f32 %v158_v39, 0.0  ;;  %v149_v48 = vadd.f32 %v148_v32, %v69_v46 }
  0x95   :  { %v168_v54 = vmax.f32 %v149_v48, 0.0  ;;  %v243_v14 = vpop.permute.xlu0 %242 }
  0x96   :  { %v245_v15 = vperm.slane %v243_v14, 0 }
  0x98   :  { %v160_v31 = vpop.f32.mrf.mxu3 }
  0x99   :  { %v161_v37 = vadd.f32 %v160_v31, %v89_v34 }
  0x9a   :  { %v151_v41 = vpop.f32.mrf.mxu0 }
  0x9b   :  { %v172_v43 = vmax.f32 %v161_v37, 0.0  ;;  %v152_v45 = vadd.f32 %v151_v41, %v74_v33 }
  0x9d   :  { %v169_v52 = vmax.f32 %v152_v45, 0.0 }
  0xa0   :  { %v163_v36 = vpop.f32.mrf.mxu3 }
  0xa1   :  { %v164_v38 = vadd.f32 %v163_v36, %v94_v29 }
  0xa3   :  { %v173_v40 = vmax.f32 %v164_v38, 0.0 }
  0xa5   :  { %215 = vmatpush.msra.mxu1 %v173_v40  ;;  %291 = vmatpush.msra.mxu2 %v173_v40 }
  0xa7   :  { %216 = vmatpush.msra.mxu1 %v172_v43  ;;  %292 = vmatpush.msra.mxu2 %v172_v43 }
  0xa9   :  { %217 = vmatpush.msra.mxu1 %v171_v44  ;;  %293 = vmatpush.msra.mxu2 %v171_v44 }
  0xab   :  { %218 = vmatpush.msra.mxu1 %v170_v47  ;;  %294 = vmatpush.msra.mxu2 %v170_v47 }
  0xad   :  { %219 = vmatpush.msra.mxu1 %v169_v52  ;;  %295 = vmatpush.msra.mxu2 %v169_v52 }
  0xaf   :  { %220 = vmatpush.msra.mxu1 %v168_v54  ;;  %296 = vmatpush.msra.mxu2 %v168_v54 }
  0xb1   :  { %221 = vmatpush.msra.mxu1 %v167_v55  ;;  %297 = vmatpush.msra.mxu2 %v167_v55 }
  0xb3   :  { %222 = vmatpush.msra.mxu1 %v166_v56  ;;  %298 = vmatpush.msra.mxu2 %v166_v56 }
  0xb4   :  { %284 = vmatmul.msk.f32.vlgmr.msra.gmra.mxu1 %vm194_vm2, %v44_v57  ;;  %287 = vmatmul.msk.f32.vlgmr.msra.gmra.mxu2 %vm194_vm2, %v47_v58 }
  0xbc   :  { %285 = vmatmul.msk.f32.gmra.mxu1 %vm194_vm2, %v45_v59 }
  0xc4   :  { %286 = vmatmul.msk.f32.gmra.mxu1 %vm194_vm2, %v46_v60 }
 0x131   :  { %v224_v61 = vpop.f32.mrf.mxu1 }
 0x132   :  { %v225_v9 = vadd.f32 %v224_v61, %v177_v8 }
 0x134   :  { %v236_v12 = vmax.f32 %v225_v9, 0.0 }
 0x137   :  { %v233_v63 = vpop.f32.mrf.mxu2 }
 0x138   :  { %v234_v0 = vadd.f32 %v233_v63, %v192_v62 }
 0x139   :  { %v227_v1 = vpop.f32.mrf.mxu1 }
 0x13a   :  { %v239_v2 = vmax.f32 %v234_v0, 0.0  ;;  %v228_v6 = vadd.f32 %v227_v1, %v182_v4 }
 0x13c   :  { %262 = vmatpush.msrb.mxu2 %v239_v2  ;;  %v237_v11 = vmax.f32 %v228_v6, 0.0 }
 0x141   :  { %v230_v5 = vpop.f32.mrf.mxu1 }
 0x142   :  { %v231_v7 = vadd.f32 %v230_v5, %v187_v3 }
 0x144   :  { %v238_v10 = vmax.f32 %v231_v7, 0.0 }
 0x146   :  { %263 = vmatpush.msrb.mxu2 %v238_v10 }
 0x148   :  { %264 = vmatpush.msrb.mxu2 %v237_v11 }
 0x14a   :  { %265 = vmatpush.msrb.mxu2 %v236_v12 }
 0x14b   :  { %288 = vmatmul.msk.f32.vlgmr.msrb.gmra.mxu2 %vm246_vm3, %v52_v13 }
 0x1ce   :  { %v267_v16 = vpop.f32.mrf.mxu2 }
 0x1cf   :  { %v268_v17 = vadd.f32 %v267_v16, %v245_v15 }
 0x1d1   :  { %270 = vst [vmem:[%s446_s7] sm:$0x1] %v268_v17 }

</bundles_post_ra>
